<compile_context>
chip_gen: v6e
topology: v6e:2x2x1
jax: 0.10.0
libtpu: 0.0.40
codegen_flags: <defaults>
</compile_context>

<pallas_src>
import math

import jax
import jax.numpy as jnp
from jax.experimental import pallas as pl
from jax.experimental.pallas import tpu as pltpu

_LANE = 128


def _recourse_kernel(x_ref, a_ref, o_ref):
    # x_ref: (TB, TH) input tile, a_ref: (1, TH) action tile (broadcast over
    # sublanes), o_ref: (TB, TH) output tile.
    o_ref[...] = x_ref[...].astype(o_ref.dtype) + a_ref[...].astype(o_ref.dtype)


def _round_up(n: int, m: int) -> int:
    return ((n + m - 1) // m) * m


def _sublane_pack(dtype) -> int:
    # f32 -> 8 rows/vreg, bf16 -> 16, int8/fp8 -> 32.
    itemsize = jnp.dtype(dtype).itemsize
    return 8 * max(1, 4 // itemsize)


def _vmem_capacity_bytes() -> int:
    """Physical VMEM of the local TPU; conservative (v7x) fallback."""
    try:
        cap = int(getattr(pltpu.get_tpu_info(), "vmem_capacity_bytes", 0))
        if cap > 0:
            return cap
    except Exception:
        pass
    return 64 << 20  # v7x per-TC size; safe lower bound for v5e/v6e too


def _pallas_broadcast_add(x, action, out_dtype, vmem_budget_bytes, max_th):
    """x: [B, H] (+ action [H]) -> x + action via a tiled Pallas kernel."""
    B, H = x.shape
    isz_x = jnp.dtype(x.dtype).itemsize
    isz_a = jnp.dtype(action.dtype).itemsize
    isz_o = jnp.dtype(out_dtype).itemsize

    cap = _vmem_capacity_bytes()
    if vmem_budget_bytes is None:
        # ~32 MiB working set on 64 MiB parts (v7x), ~48 MiB on 128 MiB parts.
        vmem_budget_bytes = min(cap // 2, 48 << 20)

    # ---- feature (lane) tile ------------------------------------------------
    max_th = max(_LANE, (max_th // _LANE) * _LANE)   # keep multiple of 128
    th = H if H <= max_th else max_th                # partial last block is OK

    # ---- batch (sublane) tile ------------------------------------------------
    pack = max(_sublane_pack(x.dtype), _sublane_pack(out_dtype))
    bytes_per_row = th * 2 * (isz_x + isz_o)         # double-buffered in + out
    tb = max(pack, (vmem_budget_bytes // max(bytes_per_row, 1)) // pack * pack)
    # Guarantee >= 2 batch grid steps when the batch allows it (v7x megacore
    # split + input/output pipeline overlap on all generations).
    if B >= 2 * pack:
        tb = min(tb, _round_up(-(-B // 2), pack))
    if tb >= B:
        tb = B                                       # full extent is always legal

    nb = pl.cdiv(B, tb)
    nh = pl.cdiv(H, th)

    a2d = action.reshape(1, H)

    # ---- VMEM limit: working set + headroom, clamped per generation ----------
    working = 2 * tb * th * isz_x + 2 * tb * th * isz_o + 2 * th * isz_a
    vmem_limit = min(max(int(working * 1.5), 32 << 20), int(cap * 3 // 4))

    cost = pl.CostEstimate(
        flops=B * H,
        transcendentals=0,
        bytes_accessed=B * H * isz_x + B * H * isz_o + H * isz_a,
    )

    if nh == 1:
        grid = (nb,)
        in_specs = [
            pl.BlockSpec((tb, H), lambda i: (i, 0)),
            pl.BlockSpec((1, H), lambda i: (0, 0)),
        ]
        out_specs = pl.BlockSpec((tb, H), lambda i: (i, 0))
        dims = ("parallel",)
    else:
        # Feature axis outermost so the (1, th) action tile stays resident
        # across the inner batch loop instead of being re-fetched every step.
        grid = (nh, nb)
        in_specs = [
            pl.BlockSpec((tb, th), lambda j, i: (i, j)),
            pl.BlockSpec((1, th), lambda j, i: (0, j)),
        ]
        out_specs = pl.BlockSpec((tb, th), lambda j, i: (i, j))
        dims = ("parallel", "parallel")

    return pl.pallas_call(
        _recourse_kernel,
        out_shape=jax.ShapeDtypeStruct((B, H), out_dtype),
        grid_spec=pltpu.PrefetchScalarGridSpec(
            num_scalar_prefetch=0,
            grid=grid,
            in_specs=in_specs,
            out_specs=out_specs,
        ),
        compiler_params=pltpu.CompilerParams(
            dimension_semantics=dims,
            vmem_limit_bytes=vmem_limit,
        ),
        cost_estimate=cost,
    )(x, a2d)


def recourse_forward(
    x: jax.Array,
    action: jax.Array,
    weight: jax.Array = None,  # ignored, as in the PyTorch module
    *,
    vmem_budget_bytes: int = None,
    max_th: int = 4096,
    small_fast_path_bytes: int = 1 << 20,
) -> jax.Array:
    """Recourse.forward: x + action (action broadcasts over the batch)."""
    del weight  # unused by the original module's forward

    # Fast path: non-2D / mismatched / tiny inputs — a plain fused XLA add is
    # strictly faster than a standalone kernel launch and lets XLA fuse with
    # neighboring ops.
    if (
        x.ndim != 2
        or action.ndim != 1
        or action.shape[0] != x.shape[-1]
        or x.size == 0
        or x.size * jnp.dtype(x.dtype).itemsize < small_fast_path_bytes
    ):
        return x + action

    B, H = x.shape
    out_dtype = jnp.result_type(x.dtype, action.dtype)

    # Lane-densify narrow feature dims: fold k batch rows into the lane axis so
    # stores are full unmasked 128-lane writes.
    if H < _LANE:
        k = _LANE // math.gcd(H, _LANE)
        if k > 1 and B % k == 0:
            out = _pallas_broadcast_add(
                x.reshape(B // k, k * H),
                jnp.tile(action, k),
                out_dtype,
                vmem_budget_bytes,
                max_th,
            )
            return out.reshape(B, H)

    return _pallas_broadcast_add(x, action, out_dtype, vmem_budget_bytes, max_th)


if __name__ == "__main__":
    key = jax.random.PRNGKey(0)
    k1, k2, k3, k4, k5 = jax.random.split(key, 5)

    # 1) Module-sized small case (x: [batch, hidden]); takes the fused-XLA fast
    #    path by design for such tiny inputs.
    B, H = 4, 32
    x = jax.random.normal(k1, (B, H), dtype=jnp.float32)
    action = jax.random.normal(k2, (H,), dtype=jnp.float32)
    out = jax.block_until_ready(recourse_forward(x, action))
    ref = x + action[None, :]
    assert out.shape == ref.shape and out.dtype == ref.dtype
    assert jnp.allclose(out, ref, atol=1e-6), "mismatch vs reference (fast path)"

    # 2) Pallas kernel path: partial trailing batch block + >=2 grid steps.
    B2, H2 = 300, 512
    x2 = jax.random.normal(k3, (B2, H2), dtype=jnp.float32)
    a2 = jax.random.normal(k4, (H2,), dtype=jnp.float32)
    out2 = jax.block_until_ready(recourse_forward(x2, a2, small_fast_path_bytes=0))
    assert jnp.allclose(out2, x2 + a2[None, :], atol=1e-6), "mismatch (kernel path)"

    # 3) Narrow-H lane-densified path (H < 128 folded into lanes; zero action
    #    matches nn.Parameter(torch.zeros(size)) init).
    B3, H3 = 256, 32
    x3 = jax.random.normal(k5, (B3, H3), dtype=jnp.float32)
    a3 = jnp.zeros((H3,), dtype=jnp.float32)
    out3 = jax.block_until_ready(recourse_forward(x3, a3, small_fast_path_bytes=0))
    assert jnp.allclose(out3, x3 + a3[None, :], atol=1e-6), "mismatch (folded path)"

    # 4) Feature-tiled path (H split across multiple lane tiles; feature axis
    #    outermost so the action tile stays resident).
    B4, H4 = 64, 4096
    x4 = jax.random.normal(jax.random.PRNGKey(7), (B4, H4), dtype=jnp.float32)
    a4 = jax.random.normal(jax.random.PRNGKey(8), (H4,), dtype=jnp.float32)
    out4 = jax.block_until_ready(
        recourse_forward(x4, a4, small_fast_path_bytes=0, max_th=1024)
    )
    assert jnp.allclose(out4, x4 + a4[None, :], atol=1e-6), "mismatch (H-tiled path)"

    print("KERNEL_OK")
</pallas_src>

<mosaic_0001>
module attributes {stable_mosaic.version = 11 : i64} {
  func.func @_recourse_kernel(%arg0: i32, %arg1: memref<152x512xf32, #tpu.memory_space<vmem>>, %arg2: memref<1x512xf32, #tpu.memory_space<vmem>>, %arg3: memref<152x512xf32, #tpu.memory_space<vmem>>) attributes {dimension_semantics = [#tpu.dimension_semantics<parallel>], iteration_bounds = array<i64: 2>, scalar_prefetch = 0 : i64, scratch_operands = 0 : i64, tpu.core_type = #tpu.core_type<tc>, window_params = [{transform_indices = @transform_0, window_bounds = array<i64: 152, 512>}, {pipeline_mode = #tpu.pipeline_mode<synchronous>, transform_indices = @transform_1, window_bounds = array<i64: 1, 512>}, {transform_indices = @transform_2, window_bounds = array<i64: 152, 512>}]} {
    %c0 = arith.constant 0 : index
    %c0_0 = arith.constant 0 : index
    %0 = vector.load %arg1[%c0, %c0_0] : memref<152x512xf32, #tpu.memory_space<vmem>>, vector<152x512xf32>
    %c0_1 = arith.constant 0 : index
    %c0_2 = arith.constant 0 : index
    %1 = vector.load %arg2[%c0_1, %c0_2] : memref<1x512xf32, #tpu.memory_space<vmem>>, vector<1x512xf32>
    %2 = vector.broadcast %1 : vector<1x512xf32> to vector<152x512xf32>
    %3 = arith.addf %0, %2 : vector<152x512xf32>
    %c0_3 = arith.constant 0 : index
    %c0_4 = arith.constant 0 : index
    %4 = vector.load %arg3[%c0_3, %c0_4] : memref<152x512xf32, #tpu.memory_space<vmem>>, vector<152x512xf32>
    tpu.vector_store %arg3[%c0_3, %c0_4], %3 {strides = array<i32>} : memref<152x512xf32, #tpu.memory_space<vmem>>, vector<152x512xf32>,
    return
  }
  func.func @transform_0(%arg0: i32) -> (i32, i32) {
    %c0_i32 = arith.constant 0 : i32
    %c0_i32_0 = arith.constant 0 : i32
    return %arg0, %c0_i32 : i32, i32
  }
  func.func @transform_1(%arg0: i32) -> (i32, i32) {
    %c0_i32 = arith.constant 0 : i32
    %c0_i32_0 = arith.constant 0 : i32
    %c0_i32_1 = arith.constant 0 : i32
    return %c0_i32, %c0_i32_0 : i32, i32
  }
  func.func @transform_2(%arg0: i32) -> (i32, i32) {
    %c0_i32 = arith.constant 0 : i32
    %c0_i32_0 = arith.constant 0 : i32
    return %arg0, %c0_i32 : i32, i32
  }
}

</mosaic_0001>

<bundles_post_ra>
// kernel: tpu_custom_call.1
= control target key start
LH: loop header
LB: loop body
LE: loop exit
PB: predicated region body
PF: predicated region fallthrough
CT: control target
= control target key end

     0   :  { %7 = vsyncpa [#allocation3], 0  ;;  %s1181_s0 = inlined_call_operand.hbm [shape: f32[300,512], index: 0, kind: input, shape index: {}]   ;;  %s1182_s1 = inlined_call_operand.hbm [shape: f32[1,512], index: 1, kind: input, shape index: {}]   ;;  %s1183_s2 = inlined_call_operand.hbm [shape: f32[300,512], index: 2, kind: output, shape index: {}]  }
   0x1   :  { %9 = vsyncpa [#allocation3 + $0x1], 0 }
   0x2   :  { %10 = vsyncpa [#allocation6], 0 }
   0x3   :  { %11 = vsyncpa [#allocation4], 0 }
   0x4   :  { %13 = vsyncpa [#allocation4 + $0x1], 0  ;;  %s753_s9 = smov 0   ;;  %s755_s10 = smov 0  }
   0x5   :  { %s757_s11 = smov 0   ;;  %s759_s12 = smov 0  }
   0x6 LB: > { %s774_s13 = sadd.s32 4294967295, %s729_s12   ;;  %s526_s14 = sadd.s32 4294967294, %s729_s12   ;;  %s729_s12 = sphi %s759_s12, %s1206_s12   ;;  %s725_s11 = sphi %s757_s11, %s1205_s11   ;;  %s721_s10 = sphi %s755_s10, %s1204_s10   ;;  %s717_s9 = sphi %s753_s9, %s1203_s9  }
   0x7   : > { %s778_s15 = sadd.s32 1, %s729_s12   ;;  %s26_s16 = sadd.s32 1, %s725_s11 }
   0x8   : > { %s23_s17 = ssub.s32 %s729_s12, %s778_s15  ;;  %p33_p0 = scmp.ne.s32.totalorder %s725_s11, %s721_s10 }
   0x9   : > { %p24_p1 = scmp.eq.s32.totalorder %s23_s17, 0  ;;  %p34_p2 = scmp.eq.s32.totalorder %s729_s12, 0 }
   0xa   : > { %p39_p3 = scmp.ne.s32.totalorder %s721_s10, %s717_s9  ;;  %p1184_p4 = scmp.eq.s32.totalorder %s774_s13, 0 }
   0xb   : > { %s790_s18 = scalar_select %p24_p1, %s725_s11, %s26_s16  }
   0xc   : > { %p792_p5 = por %p34_p2, %p33_p0  ;;  %p798_p6 = por %p1184_p4, %p39_p3 }
   0xd   : > { %p84_p7 = scmp.eq.s32.totalorder %s774_s13, 1  ;;  %p90_p8 = scmp.eq.s32.totalorder %s526_s14, 1 }
   0xe   : > { %s1189_s20 = scalar_select %p798_p6, 1, 0 }
   0xf   : > { %p527_p9 = scmp.ge.s32.totalorder %s729_s12, 1  ;;  %p97_p10 = scmp.lt.s32.totalorder %s729_s12, 3 }
  0x10   : > { %p805_p11 = por %p84_p7, %p33_p0  ;;  %p809_p12 = por %p90_p8, %p39_p3 }
  0x11   : > { %p813_p13 = pnand %p527_p9, %p97_p10  ;;  %s731_s24 = smov [#allocation5]  }
  0x12   : > { %s1190_s21 = scalar_select %p805_p11, 1, 0 }
  0x13   : > { %s1191_s22 = scalar_select %p809_p12, 1, 0 }
  0x14   : > { %s1192_s23 = scalar_select %p813_p13, 1, 0 }
  0x15   : > { %p554_p2 = pneg %p813_p13  ;;  %s110_s25 = sshll.u32 %s731_s24, 4  ;;  %s111_s25 = int_to_ptr.vmem [resolvable:$true] %s110_s25 }
  0x16   : > { %p567_p4 = scmp.lt.s32.totalorder %s729_s12, 2  ;;  %p1193_p0 = scmp.eq.s32.totalorder %s774_s13, 0 }
  0x17   : > { %s121_s27 = sand.u32 1, %s725_s11   ;;  %s618_s30 = scalar_lea.vmem %s111_s25, 64 }
  0x18   : > { %p823_p7 = pnand %p554_p2, %p1193_p0  ;;  %p830_p3 = pnand %p567_p4, %p792_p5 }
  0x19   : > { %s544_s29 = smul.u32 608, %s121_s27  ;;  %p619_p9 = scmp.ne.s32.totalorder %s111_s25, %s618_s30 }
  0x1a   : > { %p609_p8 = pneg %p823_p7  ;;  %p626_p12 = scmp.lt.s32.totalorder %s111_s25, %s111_s25 }
  0x1b   : > { %p627_p11 = scmp.lt.s32.totalorder %s618_s30, %s618_s30 }
  0x1c   : > { %p621_p10 = pnand %p619_p9, %p609_p8 }
  0x1d   : > { %p628_p2 = por %p627_p11, %p626_p12 }
  0x1e   : > { %p622_p1 = pneg %p621_p10 }
  0x20   : > { %p629_p0 = pnand %p628_p2, %p622_p1 }
  0x22   : > { %632 = shalt.err (!%p629_p0)
}
  0x23   : > { %557 = dma.hbm_to_vmem [thread:$0]  (!%p823_p7), %s1182_s1, 64, %s111_s25, [#allocation6]  }
  0x24   : > { %s542_s5 = smul.u32 9728, %s729_s12  ;;  %s125_s6 = scalar_lea.vmem [#allocation2], %s544_s29 }
  0x25   : > { %s133_s7 = sshll.u32 %s125_s6, 4  ;;  %s849_s17 = scalar_lea.sflag [#allocation3], %s121_s27  ;;  %s842_s7 = int_to_ptr.vmem [resolvable:$true] %s133_s7 }
  0x26   : > { %s847_s16 = scalar_lea.hbm %s1181_s0, %s542_s5  ;;  %p635_p5 = pneg %p830_p3 }
  0x27   : > { %s633_s19 = scalar_lea.hbm %s847_s16, 9728  ;;  %s638_s26 = scalar_lea.hbm %s1181_s0, 19456 }
  0x28   : > { %p634_p4 = scmp.ne.s32.totalorder %s847_s16, %s633_s19  ;;  %p639_p1 = scmp.lt.s32.totalorder %s847_s16, %s1181_s0 }
  0x29   : > { %p640_p7 = scmp.lt.s32.totalorder %s638_s26, %s633_s19 }
  0x2a   : > { %p636_p11 = pnand %p635_p5, %p634_p4 }
  0x2b   : > { %p641_p8 = por %p640_p7, %p639_p1 }
  0x2c   : > { %p637_p12 = pneg %p636_p11 }
  0x2e   : > { %p642_p9 = pnand %p641_p8, %p637_p12 }
  0x30   : > { %645 = shalt.err (!%p642_p9)
}
  0x31   : > { %s646_s27 = scalar_lea.vmem %s842_s7, 9728  ;;  %s732_s3 = smov [#allocation2]  }
  0x32   : > { %p647_p10 = scmp.ne.s32.totalorder %s842_s7, %s646_s27  ;;  %s651_s4 = sshll.u32 %s732_s3, 4  ;;  %s652_s4 = int_to_ptr.vmem [resolvable:$false] %s651_s4 }
  0x33   : > { %s653_s5 = scalar_lea.vmem %s652_s4, 19456  ;;  %p654_p4 = scmp.lt.s32.totalorder %s842_s7, %s652_s4 }
  0x34   : > { %p649_p2 = pnand %p647_p10, %p635_p5  ;;  %p655_p11 = scmp.lt.s32.totalorder %s653_s5, %s646_s27 }
  0x36   : > { %p650_p0 = pneg %p649_p2  ;;  %p656_p6 = por %p655_p11, %p654_p4 }
  0x38   : > { %p657_p13 = pnand %p656_p6, %p650_p0 }
  0x3a   : > { %660 = shalt.err (!%p657_p13)
}
  0x3b   : > { %s733_s6 = smov 512   ;;  %s734_s8 = smov 32  }
  0x3c   : > { %561 = dma.hbm_to_vmem [thread:$0]  (!%p830_p3), %s847_s16, 9728, %s842_s7, %s849_s17, %s733_s6, %s733_s6, %s734_s8  }
  0x3d   : > { %p1196_p5 = scmp.ne.s32.totalorder %s1192_s23, 0 }
  0x3e   : > { %s873_s14 = sand.u32 (!%p1196_p5), 1, %s721_s10   ;;  %p1197_p6 = scmp.ne.s32.totalorder (!%p1196_p5), %s1189_s20, 0 }
  0x3f   : > { %145 = sbr.rel (%p1196_p5) target bundleno = 133 (0x85), region = 28  ;;  %s148_s24 = scalar_lea.sflag (!%p1196_p5), [#allocation3], %s873_s14 }
  0x40   : > { %s545_s19 = smul.u32 (!%p1196_p5), 608, %s873_s14 }
  0x42   : > { %s879_s25 = scalar_lea.vmem (!%p1196_p5), [#allocation2], %s545_s19 }
  0x44   : > { %704 = dma.done.wait (%p1197_p6), %s148_s24, 9728  }
  0x45   : > { %706 = vsyncadd (%p1197_p6), %s148_s24, 4294957568  ;;  %p1198_p13 = scmp.eq.s32.totalorder %s774_s13, 0 }
  0x47   : > { %708 = dma.done.wait (%p1198_p13), [#allocation6], 64   ;;  %p1199_p3 = pmov %p1198_p13 }
  0x48   : > { %v256_v0 = vlaneseq  ;;  %v178_v6 = vld [vmem:[%s879_s25] sm:$0xff]  ;;  %v179_v8 = vld [vmem:[%s879_s25 + $0x8] sm:$0xff]  ;;  %v180_v11 = vld [vmem:[%s879_s25 + $0x10] sm:$0xff]  ;;  %s921_s20 = scalar_lea.vmem [#allocation7], %s545_s19  ;;  %s543_s23 = smul.u32 9728, %s774_s13 }
  0x49   : > { %710 = vsyncadd (%p1199_p3), [#allocation6], 4294967232  ;;  %v254_v7 = vld [vmem:[#allocation5] sm:$0xf]  ;;  %v181_v13 = vld [vmem:[%s879_s25 + $0x18] sm:$0xff]  ;;  %s443_s28 = sshll.u32 %s921_s20, 4  ;;  %s1121_s28 = int_to_ptr.vmem [resolvable:$true] %s443_s28 }
  0x4a   : > { %v257_v1 = vshrl.u32 %v256_v0, 7  ;;  %v182_v15 = vld [vmem:[%s879_s25 + $0x20] sm:$0xff]  ;;  %v183_v16 = vld [vmem:[%s879_s25 + $0x28] sm:$0xff]  ;;  %v184_v17 = vld [vmem:[%s879_s25 + $0x30] sm:$0xff]  ;;  %s1133_s17 = scalar_lea.hbm %s1183_s2, %s543_s23  ;;  %s429_s26 = scalar_lea.sflag [#allocation4], %s873_s14 }
  0x4b   : > { %v185_v18 = vld [vmem:[%s879_s25 + $0x38] sm:$0xff]  ;;  %v186_v23 = vld [vmem:[%s879_s25 + $0x40] sm:$0xff]  ;;  %v187_v24 = vld [vmem:[%s879_s25 + $0x48] sm:$0xff]  ;;  %s661_s29 = scalar_lea.vmem %s1121_s28, 9728  ;;  %p1200_p1 = scmp.ne.s32.totalorder %s1190_s21, 0 }
  0x4c   : > { %v258_v2 = vsub.s32 0, %v257_v1  ;;  %v262_v3 = vsub.s32 1, %v257_v1  ;;  %v266_v4 = vsub.s32 2, %v257_v1  ;;  %v270_v5 = vsub.s32 3, %v257_v1  ;;  %v188_v25 = vld [vmem:[%s879_s25 + $0x50] sm:$0xff]  ;;  %v189_v30 = vld [vmem:[%s879_s25 + $0x58] sm:$0xff]  ;;  %p662_p12 = scmp.ne.s32.totalorder %s1121_s28, %s661_s29 }
  0x4d   : > { %v190_v31 = vld [vmem:[%s879_s25 + $0x60] sm:$0xff]  ;;  %v191_v32 = vld [vmem:[%s879_s25 + $0x68] sm:$0xff]  ;;  %v192_v37 = vld [vmem:[%s879_s25 + $0x70] sm:$0xff]  ;;  %s735_s30 = smov [#allocation7]  }
  0x4e   : > { %v891_v9 = vrot.slane %v254_v7, %v258_v2  ;;  %v893_v10 = vrot.slane %v254_v7, %v262_v3  ;;  %v896_v12 = vrot.slane %v254_v7, %v266_v4  ;;  %v899_v14 = vrot.slane %v254_v7, %v270_v5  ;;  %v193_v38 = vld [vmem:[%s879_s25 + $0x78] sm:$0xff]  ;;  %v194_v39 = vld [vmem:[%s879_s25 + $0x80] sm:$0xff]  ;;  %v195_v44 = vld [vmem:[%s879_s25 + $0x88] sm:$0xff]  ;;  %p663_p7 = pnand %p662_p12, %p1200_p1  ;;  %s665_s27 = sshll.u32 %s735_s30, 4  ;;  %s666_s27 = int_to_ptr.vmem [resolvable:$false] %s665_s27 }
  0x4f   : > { %v196_v45 = vld [vmem:[%s879_s25 + $0x90] sm:$0xff]  ;;  %v197_v46 = vld [vmem:[%s879_s25 + $0x98] sm:$0xff]  ;;  %v198_v51 = vld [vmem:[%s879_s25 + $0xa0] sm:$0xff]  ;;  %s667_s13 = scalar_lea.vmem %s666_s27, 19456  ;;  %p668_p9 = scmp.lt.s32.totalorder %s1121_s28, %s666_s27 }
  0x50   : > { %v276_v19 = vadd.f32 %v891_v9, %v178_v6  ;;  %v277_v20 = vadd.f32 %v893_v10, %v179_v8  ;;  %v278_v21 = vadd.f32 %v896_v12, %v180_v11  ;;  %v279_v22 = vadd.f32 %v899_v14, %v181_v13  ;;  %v199_v52 = vld [vmem:[%s879_s25 + $0xa8] sm:$0xff]  ;;  %v200_v53 = vld [vmem:[%s879_s25 + $0xb0] sm:$0xff]  ;;  %v201_v57 = vld [vmem:[%s879_s25 + $0xb8] sm:$0xff]  ;;  %p664_p8 = pneg %p663_p7  ;;  %p669_p10 = scmp.lt.s32.totalorder %s667_s13, %s661_s29 }
  0x51   : > { %v280_v26 = vadd.f32 %v891_v9, %v182_v15  ;;  %v281_v27 = vadd.f32 %v893_v10, %v183_v16  ;;  %v282_v28 = vadd.f32 %v896_v12, %v184_v17  ;;  %v283_v29 = vadd.f32 %v899_v14, %v185_v18  ;;  %v202_v58 = vld [vmem:[%s879_s25 + $0xc0] sm:$0xff]  ;;  %v203_v59 = vld [vmem:[%s879_s25 + $0xc8] sm:$0xff]  ;;  %v204_v63 = vld [vmem:[%s879_s25 + $0xd0] sm:$0xff] }
  0x52   : > { %352 = vst [vmem:[%s921_s20] sm:$0xff] %v276_v19  ;;  %353 = vst [vmem:[%s921_s20 + $0x8] sm:$0xff] %v277_v20  ;;  %v284_v33 = vadd.f32 %v891_v9, %v186_v23  ;;  %v285_v34 = vadd.f32 %v893_v10, %v187_v24  ;;  %v286_v35 = vadd.f32 %v896_v12, %v188_v25  ;;  %v205_v0 = vld [vmem:[%s879_s25 + $0xd8] sm:$0xff]  ;;  %v206_v1 = vld [vmem:[%s879_s25 + $0xe0] sm:$0xff]  ;;  %p670_p2 = por %p669_p10, %p668_p9 }
  0x53   : > { %354 = vst [vmem:[%s921_s20 + $0x10] sm:$0xff] %v278_v21  ;;  %355 = vst [vmem:[%s921_s20 + $0x18] sm:$0xff] %v279_v22  ;;  %v287_v36 = vadd.f32 %v899_v14, %v189_v30  ;;  %v288_v40 = vadd.f32 %v891_v9, %v190_v31  ;;  %v289_v41 = vadd.f32 %v893_v10, %v191_v32  ;;  %v207_v5 = vld [vmem:[%s879_s25 + $0xe8] sm:$0xff]  ;;  %v208_v6 = vld [vmem:[%s879_s25 + $0xf0] sm:$0xff] }
  0x54   : > { %356 = vst [vmem:[%s921_s20 + $0x20] sm:$0xff] %v280_v26  ;;  %357 = vst [vmem:[%s921_s20 + $0x28] sm:$0xff] %v281_v27  ;;  %v290_v42 = vadd.f32 %v896_v12, %v192_v37  ;;  %v291_v43 = vadd.f32 %v899_v14, %v193_v38  ;;  %v292_v47 = vadd.f32 %v891_v9, %v194_v39  ;;  %v209_v7 = vld [vmem:[%s879_s25 + $0xf8] sm:$0xff]  ;;  %v210_v15 = vld [vmem:[%s879_s25 + $0x100] sm:$0xff]  ;;  %p671_p0 = pnand %p670_p2, %p664_p8 }
  0x55   : > { %358 = vst [vmem:[%s921_s20 + $0x30] sm:$0xff] %v282_v28  ;;  %359 = vst [vmem:[%s921_s20 + $0x38] sm:$0xff] %v283_v29  ;;  %v293_v48 = vadd.f32 %v893_v10, %v195_v44  ;;  %v294_v49 = vadd.f32 %v896_v12, %v196_v45  ;;  %v295_v50 = vadd.f32 %v899_v14, %v197_v46  ;;  %v211_v16 = vld [vmem:[%s879_s25 + $0x108] sm:$0xff]  ;;  %v212_v17 = vld [vmem:[%s879_s25 + $0x110] sm:$0xff] }
  0x56   : > { %360 = vst [vmem:[%s921_s20 + $0x40] sm:$0xff] %v284_v33  ;;  %361 = vst [vmem:[%s921_s20 + $0x48] sm:$0xff] %v285_v34  ;;  %v296_v54 = vadd.f32 %v891_v9, %v198_v51  ;;  %v297_v55 = vadd.f32 %v893_v10, %v199_v52  ;;  %v298_v56 = vadd.f32 %v896_v12, %v200_v53  ;;  %v213_v21 = vld [vmem:[%s879_s25 + $0x118] sm:$0xff]  ;;  %v214_v22 = vld [vmem:[%s879_s25 + $0x120] sm:$0xff] }
  0x57   : > { %362 = vst [vmem:[%s921_s20 + $0x50] sm:$0xff] %v286_v35  ;;  %363 = vst [vmem:[%s921_s20 + $0x58] sm:$0xff] %v287_v36  ;;  %v299_v60 = vadd.f32 %v899_v14, %v201_v57  ;;  %v300_v61 = vadd.f32 %v891_v9, %v202_v58  ;;  %v301_v62 = vadd.f32 %v893_v10, %v203_v59  ;;  %v215_v23 = vld [vmem:[%s879_s25 + $0x128] sm:$0xff]  ;;  %v216_v27 = vld [vmem:[%s879_s25 + $0x130] sm:$0xff] }
  0x58   : > { %364 = vst [vmem:[%s921_s20 + $0x60] sm:$0xff] %v288_v40  ;;  %365 = vst [vmem:[%s921_s20 + $0x68] sm:$0xff] %v289_v41  ;;  %v302_v2 = vadd.f32 %v896_v12, %v204_v63  ;;  %v303_v3 = vadd.f32 %v899_v14, %v205_v0  ;;  %v304_v4 = vadd.f32 %v891_v9, %v206_v1  ;;  %v217_v28 = vld [vmem:[%s879_s25 + $0x138] sm:$0xff]  ;;  %v218_v29 = vld [vmem:[%s879_s25 + $0x140] sm:$0xff] }
  0x59   : > { %366 = vst [vmem:[%s921_s20 + $0x70] sm:$0xff] %v290_v42  ;;  %367 = vst [vmem:[%s921_s20 + $0x78] sm:$0xff] %v291_v43  ;;  %v305_v8 = vadd.f32 %v893_v10, %v207_v5  ;;  %v306_v11 = vadd.f32 %v896_v12, %v208_v6  ;;  %v307_v13 = vadd.f32 %v899_v14, %v209_v7  ;;  %v219_v33 = vld [vmem:[%s879_s25 + $0x148] sm:$0xff]  ;;  %v220_v34 = vld [vmem:[%s879_s25 + $0x150] sm:$0xff] }
  0x5a   : > { %368 = vst [vmem:[%s921_s20 + $0x80] sm:$0xff] %v292_v47  ;;  %369 = vst [vmem:[%s921_s20 + $0x88] sm:$0xff] %v293_v48  ;;  %v308_v18 = vadd.f32 %v891_v9, %v210_v15  ;;  %v309_v19 = vadd.f32 %v893_v10, %v211_v16  ;;  %v310_v20 = vadd.f32 %v896_v12, %v212_v17  ;;  %v221_v35 = vld [vmem:[%s879_s25 + $0x158] sm:$0xff]  ;;  %v222_v39 = vld [vmem:[%s879_s25 + $0x160] sm:$0xff] }
  0x5b   : > { %370 = vst [vmem:[%s921_s20 + $0x90] sm:$0xff] %v294_v49  ;;  %371 = vst [vmem:[%s921_s20 + $0x98] sm:$0xff] %v295_v50  ;;  %v311_v24 = vadd.f32 %v899_v14, %v213_v21  ;;  %v312_v25 = vadd.f32 %v891_v9, %v214_v22  ;;  %v313_v26 = vadd.f32 %v893_v10, %v215_v23  ;;  %v223_v40 = vld [vmem:[%s879_s25 + $0x168] sm:$0xff]  ;;  %v224_v41 = vld [vmem:[%s879_s25 + $0x170] sm:$0xff] }
  0x5c   : > { %372 = vst [vmem:[%s921_s20 + $0xa0] sm:$0xff] %v296_v54  ;;  %373 = vst [vmem:[%s921_s20 + $0xa8] sm:$0xff] %v297_v55  ;;  %v314_v30 = vadd.f32 %v896_v12, %v216_v27  ;;  %v315_v31 = vadd.f32 %v899_v14, %v217_v28  ;;  %v316_v32 = vadd.f32 %v891_v9, %v218_v29  ;;  %v225_v45 = vld [vmem:[%s879_s25 + $0x178] sm:$0xff]  ;;  %v226_v46 = vld [vmem:[%s879_s25 + $0x180] sm:$0xff] }
  0x5d   : > { %374 = vst [vmem:[%s921_s20 + $0xb0] sm:$0xff] %v298_v56  ;;  %375 = vst [vmem:[%s921_s20 + $0xb8] sm:$0xff] %v299_v60  ;;  %v317_v36 = vadd.f32 %v893_v10, %v219_v33  ;;  %v318_v37 = vadd.f32 %v896_v12, %v220_v34  ;;  %v319_v38 = vadd.f32 %v899_v14, %v221_v35  ;;  %v227_v47 = vld [vmem:[%s879_s25 + $0x188] sm:$0xff]  ;;  %v228_v51 = vld [vmem:[%s879_s25 + $0x190] sm:$0xff] }
  0x5e   : > { %376 = vst [vmem:[%s921_s20 + $0xc0] sm:$0xff] %v300_v61  ;;  %377 = vst [vmem:[%s921_s20 + $0xc8] sm:$0xff] %v301_v62  ;;  %v320_v42 = vadd.f32 %v891_v9, %v222_v39  ;;  %v321_v43 = vadd.f32 %v893_v10, %v223_v40  ;;  %v322_v44 = vadd.f32 %v896_v12, %v224_v41  ;;  %v229_v52 = vld [vmem:[%s879_s25 + $0x198] sm:$0xff]  ;;  %v230_v53 = vld [vmem:[%s879_s25 + $0x1a0] sm:$0xff] }
  0x5f   : > { %378 = vst [vmem:[%s921_s20 + $0xd0] sm:$0xff] %v302_v2  ;;  %379 = vst [vmem:[%s921_s20 + $0xd8] sm:$0xff] %v303_v3  ;;  %v323_v48 = vadd.f32 %v899_v14, %v225_v45  ;;  %v324_v49 = vadd.f32 %v891_v9, %v226_v46  ;;  %v325_v50 = vadd.f32 %v893_v10, %v227_v47  ;;  %v231_v57 = vld [vmem:[%s879_s25 + $0x1a8] sm:$0xff]  ;;  %v232_v58 = vld [vmem:[%s879_s25 + $0x1b0] sm:$0xff] }
  0x60   : > { %380 = vst [vmem:[%s921_s20 + $0xe0] sm:$0xff] %v304_v4  ;;  %381 = vst [vmem:[%s921_s20 + $0xe8] sm:$0xff] %v305_v8  ;;  %v326_v54 = vadd.f32 %v896_v12, %v228_v51  ;;  %v327_v55 = vadd.f32 %v899_v14, %v229_v52  ;;  %v328_v56 = vadd.f32 %v891_v9, %v230_v53  ;;  %v233_v59 = vld [vmem:[%s879_s25 + $0x1b8] sm:$0xff]  ;;  %v234_v63 = vld [vmem:[%s879_s25 + $0x1c0] sm:$0xff] }
  0x61   : > { %382 = vst [vmem:[%s921_s20 + $0xf0] sm:$0xff] %v306_v11  ;;  %383 = vst [vmem:[%s921_s20 + $0xf8] sm:$0xff] %v307_v13  ;;  %v329_v60 = vadd.f32 %v893_v10, %v231_v57  ;;  %v330_v61 = vadd.f32 %v896_v12, %v232_v58  ;;  %v331_v62 = vadd.f32 %v899_v14, %v233_v59  ;;  %v235_v0 = vld [vmem:[%s879_s25 + $0x1c8] sm:$0xff]  ;;  %v236_v1 = vld [vmem:[%s879_s25 + $0x1d0] sm:$0xff] }
  0x62   : > { %384 = vst [vmem:[%s921_s20 + $0x100] sm:$0xff] %v308_v18  ;;  %385 = vst [vmem:[%s921_s20 + $0x108] sm:$0xff] %v309_v19  ;;  %v332_v2 = vadd.f32 %v891_v9, %v234_v63  ;;  %v333_v3 = vadd.f32 %v893_v10, %v235_v0  ;;  %v334_v4 = vadd.f32 %v896_v12, %v236_v1  ;;  %v237_v5 = vld [vmem:[%s879_s25 + $0x1d8] sm:$0xff]  ;;  %v238_v6 = vld [vmem:[%s879_s25 + $0x1e0] sm:$0xff] }
  0x63   : > { %386 = vst [vmem:[%s921_s20 + $0x110] sm:$0xff] %v310_v20  ;;  %387 = vst [vmem:[%s921_s20 + $0x118] sm:$0xff] %v311_v24  ;;  %v239_v7 = vld [vmem:[%s879_s25 + $0x1e8] sm:$0xff]  ;;  %v335_v8 = vadd.f32 %v899_v14, %v237_v5  ;;  %v336_v11 = vadd.f32 %v891_v9, %v238_v6  ;;  %v240_v15 = vld [vmem:[%s879_s25 + $0x1f0] sm:$0xff] }
  0x64   : > { %388 = vst [vmem:[%s921_s20 + $0x120] sm:$0xff] %v312_v25  ;;  %389 = vst [vmem:[%s921_s20 + $0x128] sm:$0xff] %v313_v26  ;;  %v337_v13 = vadd.f32 %v893_v10, %v239_v7  ;;  %v241_v16 = vld [vmem:[%s879_s25 + $0x1f8] sm:$0xff]  ;;  %v242_v17 = vld [vmem:[%s879_s25 + $0x200] sm:$0xff]  ;;  %v338_v18 = vadd.f32 %v896_v12, %v240_v15 }
  0x65   : > { %390 = vst [vmem:[%s921_s20 + $0x130] sm:$0xff] %v314_v30  ;;  %391 = vst [vmem:[%s921_s20 + $0x138] sm:$0xff] %v315_v31  ;;  %v339_v19 = vadd.f32 %v899_v14, %v241_v16  ;;  %v340_v20 = vadd.f32 %v891_v9, %v242_v17  ;;  %v243_v21 = vld [vmem:[%s879_s25 + $0x208] sm:$0xff]  ;;  %v244_v22 = vld [vmem:[%s879_s25 + $0x210] sm:$0xff] }
  0x66   : > { %392 = vst [vmem:[%s921_s20 + $0x140] sm:$0xff] %v316_v32  ;;  %393 = vst [vmem:[%s921_s20 + $0x148] sm:$0xff] %v317_v36  ;;  %v245_v23 = vld [vmem:[%s879_s25 + $0x218] sm:$0xff]  ;;  %v341_v24 = vadd.f32 %v893_v10, %v243_v21  ;;  %v342_v25 = vadd.f32 %v896_v12, %v244_v22  ;;  %v246_v27 = vld [vmem:[%s879_s25 + $0x220] sm:$0xff] }
  0x67   : > { %394 = vst [vmem:[%s921_s20 + $0x150] sm:$0xff] %v318_v37  ;;  %395 = vst [vmem:[%s921_s20 + $0x158] sm:$0xff] %v319_v38  ;;  %v343_v26 = vadd.f32 %v899_v14, %v245_v23  ;;  %v247_v28 = vld [vmem:[%s879_s25 + $0x228] sm:$0xff]  ;;  %v248_v29 = vld [vmem:[%s879_s25 + $0x230] sm:$0xff]  ;;  %v344_v30 = vadd.f32 %v891_v9, %v246_v27 }
  0x68   : > { %396 = vst [vmem:[%s921_s20 + $0x160] sm:$0xff] %v320_v42  ;;  %397 = vst [vmem:[%s921_s20 + $0x168] sm:$0xff] %v321_v43  ;;  %v345_v31 = vadd.f32 %v893_v10, %v247_v28  ;;  %v346_v32 = vadd.f32 %v896_v12, %v248_v29  ;;  %v249_v33 = vld [vmem:[%s879_s25 + $0x238] sm:$0xff]  ;;  %v250_v34 = vld [vmem:[%s879_s25 + $0x240] sm:$0xff] }
  0x69   : > { %398 = vst [vmem:[%s921_s20 + $0x170] sm:$0xff] %v322_v44  ;;  %399 = vst [vmem:[%s921_s20 + $0x178] sm:$0xff] %v323_v48  ;;  %v251_v35 = vld [vmem:[%s879_s25 + $0x248] sm:$0xff]  ;;  %v347_v36 = vadd.f32 %v899_v14, %v249_v33  ;;  %v348_v37 = vadd.f32 %v891_v9, %v250_v34  ;;  %v252_v39 = vld [vmem:[%s879_s25 + $0x250] sm:$0xff] }
  0x6a   : > { %400 = vst [vmem:[%s921_s20 + $0x180] sm:$0xff] %v324_v49  ;;  %401 = vst [vmem:[%s921_s20 + $0x188] sm:$0xff] %v325_v50  ;;  %v349_v38 = vadd.f32 %v893_v10, %v251_v35  ;;  %v253_v40 = vld [vmem:[%s879_s25 + $0x258] sm:$0xff]  ;;  %v350_v41 = vadd.f32 %v896_v12, %v252_v39 }
  0x6b   : > { %402 = vst [vmem:[%s921_s20 + $0x190] sm:$0xff] %v326_v54  ;;  %403 = vst [vmem:[%s921_s20 + $0x198] sm:$0xff] %v327_v55  ;;  %v351_v42 = vadd.f32 %v899_v14, %v253_v40 }
  0x6c   : > { %404 = vst [vmem:[%s921_s20 + $0x1a0] sm:$0xff] %v328_v56  ;;  %405 = vst [vmem:[%s921_s20 + $0x1a8] sm:$0xff] %v329_v60 }
  0x6d   : > { %406 = vst [vmem:[%s921_s20 + $0x1b0] sm:$0xff] %v330_v61  ;;  %407 = vst [vmem:[%s921_s20 + $0x1b8] sm:$0xff] %v331_v62 }
  0x6e   : > { %408 = vst [vmem:[%s921_s20 + $0x1c0] sm:$0xff] %v332_v2  ;;  %409 = vst [vmem:[%s921_s20 + $0x1c8] sm:$0xff] %v333_v3 }
  0x6f   : > { %410 = vst [vmem:[%s921_s20 + $0x1d0] sm:$0xff] %v334_v4  ;;  %411 = vst [vmem:[%s921_s20 + $0x1d8] sm:$0xff] %v335_v8 }
  0x70   : > { %412 = vst [vmem:[%s921_s20 + $0x1e0] sm:$0xff] %v336_v11  ;;  %413 = vst [vmem:[%s921_s20 + $0x1e8] sm:$0xff] %v337_v13 }
  0x71   : > { %414 = vst [vmem:[%s921_s20 + $0x1f0] sm:$0xff] %v338_v18  ;;  %415 = vst [vmem:[%s921_s20 + $0x1f8] sm:$0xff] %v339_v19 }
  0x72   : > { %416 = vst [vmem:[%s921_s20 + $0x200] sm:$0xff] %v340_v20  ;;  %417 = vst [vmem:[%s921_s20 + $0x208] sm:$0xff] %v341_v24 }
  0x73   : > { %418 = vst [vmem:[%s921_s20 + $0x210] sm:$0xff] %v342_v25  ;;  %419 = vst [vmem:[%s921_s20 + $0x218] sm:$0xff] %v343_v26 }
  0x74   : > { %420 = vst [vmem:[%s921_s20 + $0x220] sm:$0xff] %v344_v30  ;;  %421 = vst [vmem:[%s921_s20 + $0x228] sm:$0xff] %v345_v31 }
  0x75   : > { %422 = vst [vmem:[%s921_s20 + $0x230] sm:$0xff] %v346_v32  ;;  %423 = vst [vmem:[%s921_s20 + $0x238] sm:$0xff] %v347_v36 }
  0x76   : > { %424 = vst [vmem:[%s921_s20 + $0x240] sm:$0xff] %v348_v37  ;;  %425 = vst [vmem:[%s921_s20 + $0x248] sm:$0xff] %v349_v38 }
  0x77   : > { %426 = vst [vmem:[%s921_s20 + $0x250] sm:$0xff] %v350_v41  ;;  %427 = vst [vmem:[%s921_s20 + $0x258] sm:$0xff] %v351_v42 }
  0x78   : > { %674 = shalt.err (!%p671_p0)
}
  0x79   : > { %s675_s3 = scalar_lea.hbm %s1133_s17, 9728  ;;  %s679_s6 = scalar_lea.hbm %s1183_s2, 19456 }
  0x7a   : > { %p676_p4 = scmp.ne.s32.totalorder %s1133_s17, %s675_s3  ;;  %p680_p6 = scmp.lt.s32.totalorder %s1133_s17, %s1183_s2 }
  0x7b   : > { %p681_p13 = scmp.lt.s32.totalorder %s679_s6, %s675_s3 }
  0x7c   : > { %p677_p11 = pnand %p676_p4, %p1200_p1 }
  0x7d   : > { %p682_p3 = por %p681_p13, %p680_p6 }
  0x7e   : > { %p678_p5 = pneg %p677_p11 }
  0x80   : > { %p683_p12 = pnand %p682_p3, %p678_p5 }
  0x82   : > { %686 = shalt.err (!%p683_p12)
}
  0x83   : > { %s736_s24 = smov 512   ;;  %s737_s25 = smov 32  }
  0x84   : > { %552 = dma.vmem_to_hbm [thread:$0]  (%p1200_p1), %s1121_s28, 9728, %s1133_s17, %s429_s26, %s736_s24, %s736_s24, %s737_s25  }
  0x85 PF: > { %s458_s20 = sand.u32 1, %s717_s9   ;;  %p1201_p7 = scmp.ne.s32.totalorder %s1191_s22, 0 }
  0x86   : > { %p1202_p8 = scmp.ge.s32.totalorder %s729_s12, 2  ;;  %s459_s23 = scalar_lea.sflag [#allocation4], %s458_s20 }
  0x88   : > { %p563_p9 = pnand %p1202_p8, %p1201_p7 }
  0x8a   : > { %p564_p10 = pneg %p563_p9 }
  0x8c   : > { %712 = dma.done.wait (%p564_p10), %s459_s23, 9728  }
  0x8d   : > { %714 = vsyncadd (%p564_p10), %s459_s23, 4294957568  ;;  %p16_p2 = scmp.ge.s32.totalorder %s778_s15, 4   ;;  %s1203_s9 = smov %s721_s10 }
  0x8e   : > { %s1204_s10 = smov %s725_s11  ;;  %s1205_s11 = smov %s790_s18 }
  0x8f   : > { %s1206_s12 = smov %s778_s15  ;;  %18 = sbr.rel (!%p16_p2) target bundleno = 6 (0x6), region = 77 }
  0x94   :  { %464 = vsyncpa [#allocation3], 1 }
  0x95   :  { %466 = vsyncpa [#allocation3 + $0x1], 1 }
  0x96   :  { %467 = vsyncpa [#allocation6], 1 }
  0x97   :  { %468 = vsyncpa [#allocation4], 1 }
  0x98   :  { %470 = vsyncpa [#allocation4 + $0x1], 1 }

</bundles_post_ra>
